<compile_context>
chip_gen: v7x
topology: tpu7x:2x2x1
jax: 0.10.0
libtpu: 0.0.40
codegen_flags: <defaults>
</compile_context>

<pallas_src>
import math
import functools

import jax
import jax.numpy as jnp
import numpy as np
from jax import lax
from jax.experimental import pallas as pl
from jax.experimental.pallas import tpu as pltpu


def _mhca_kernel(q_ref, k_ref, v_ref,
                 wq_ref, bq_ref, wk_ref, bk_ref, wv_ref, bv_ref,
                 wo_ref, bo_ref, g_ref, beta_ref,
                 o_ref,
                 k_cache, v_cache, q_scr, ctx_scr,
                 *, n_heads, d_k):
    dt = q_ref.dtype                         # native compute dtype (bf16/f32)
    f32 = jnp.float32

    # ---- K/V projections: once per batch element (first q-tile only). ------
    # The q-tile grid axis is "arbitrary", so within each batch element the
    # first tile fills the caches and subsequent tiles reuse them.
    @pl.when(pl.program_id(1) == 0)
    def _():
        k_proj = jnp.dot(k_ref[0], wk_ref[...],
                         preferred_element_type=f32) + bk_ref[...].astype(f32)
        v_proj = jnp.dot(v_ref[0], wv_ref[...],
                         preferred_element_type=f32) + bv_ref[...].astype(f32)
        k_cache[...] = k_proj.astype(dt)     # [Sk, D]
        v_cache[...] = v_proj.astype(dt)     # [Sk, D]

    # ---- Q projection for this tile (1/sqrt(d_k) pre-folded into w_q/b_q). -
    q_in = q_ref[0]                          # [tq, D] native dtype
    q_proj = jnp.dot(q_in, wq_ref[...],
                     preferred_element_type=f32) + bq_ref[...].astype(f32)
    q_scr[...] = q_proj.astype(dt)           # [tq, D]

    # ---- Per-head attention; contexts assembled at lane offsets in ctx_scr.
    def one_head(off):
        qh = q_scr[:, pl.ds(off, d_k)]       # [tq, d_k]
        kh = k_cache[:, pl.ds(off, d_k)]     # [Sk, d_k]
        vh = v_cache[:, pl.ds(off, d_k)]     # [Sk, d_k]

        # scores[q, k] = sum_d qh[q, d] * kh[k, d]  (no kh.T materialized)
        s = lax.dot_general(qh, kh,
                            dimension_numbers=(((1,), (1,)), ((), ())),
                            preferred_element_type=f32)   # [tq, Sk] f32
        m = jnp.max(s, axis=-1, keepdims=True)
        p = jnp.exp(s - m)                                 # un-normalized probs
        denom = jnp.sum(p, axis=-1, keepdims=True)         # [tq, 1]

        ctx = jnp.dot(p.astype(dt), vh, preferred_element_type=f32)  # [tq, d_k]
        # EUP approximate reciprocal; applied to [tq, d_k] (not [tq, Sk]).
        ctx = ctx * pl.reciprocal(denom, approx=True)
        ctx_scr[:, pl.ds(off, d_k)] = ctx.astype(dt)

    if n_heads < 8:
        # Small H: fully unrolled with static slices.
        for h in range(n_heads):
            one_head(h * d_k)
    else:
        # Large H: fori_loop bounds live ranges / code size.
        def body(h, carry):
            one_head(pl.multiple_of(h * d_k, d_k))
            return carry
        lax.fori_loop(0, n_heads, body, 0)

    # ---- Single full-depth output projection, residual add, LayerNorm. -----
    out = jnp.dot(ctx_scr[...], wo_ref[...], preferred_element_type=f32)  # [tq, D]
    resid = out + bo_ref[...].astype(f32) + q_in.astype(f32)
    mean = jnp.mean(resid, axis=-1, keepdims=True)
    var = jnp.mean(jnp.square(resid - mean), axis=-1, keepdims=True)
    normed = (resid - mean) * lax.rsqrt(var + 1e-5)
    o_ref[0] = (normed * g_ref[...].astype(f32)
                + beta_ref[...].astype(f32)).astype(o_ref.dtype)


def _pick_tq(sq, tq_max=256):
    """Largest query tile <= tq_max that divides Sq and satisfies (8,128) rules."""
    if sq <= tq_max:
        return sq                            # full extent is always legal
    for t in range(tq_max, 7, -8):           # multiples-of-8 candidates
        if sq % t == 0:
            return t
    raise ValueError(
        f"Sq={sq} has no tile that is a multiple of 8, <= {tq_max}, and divides Sq; "
        "pad Sq to a multiple of 8.")


def prepare_params(params, *, n_heads):
    """One-time host-side prep: fold 1/sqrt(d_k) into w_q / b_q."""
    d_model = params["w_q"].shape[0]
    scale = 1.0 / math.sqrt(d_model // n_heads)
    p = dict(params)
    p["w_q"] = params["w_q"] * scale
    p["b_q"] = params["b_q"] * scale
    return p


def multi_head_cross_attention(query, key, value, params, *, n_heads, tq_max=256):
    """query: [B, Sq, D]; key/value: [B, Sk, D].  Returns [B, Sq, D].

    `params` must be pre-processed with `prepare_params` (scale folded into w_q/b_q).
    """
    B, Sq, D = query.shape
    Sk = key.shape[1]
    assert D % n_heads == 0, "d_model must be divisible by n_heads"
    assert key.shape == value.shape and value.shape == (B, Sk, D)
    d_k = D // n_heads
    dt = query.dtype

    tq = _pick_tq(Sq, tq_max)
    assert Sq % tq == 0
    n_q_tiles = Sq // tq

    kernel = functools.partial(_mhca_kernel, n_heads=n_heads, d_k=d_k)

    q_spec = pl.BlockSpec((1, tq, D), lambda b, i: (b, i, 0))
    kv_spec = pl.BlockSpec((1, Sk, D), lambda b, i: (b, 0, 0))
    # Constant-index operands: single-buffered (no VMEM wasted on double-buffering).
    mat_spec = pl.BlockSpec((D, D), lambda b, i: (0, 0), pipeline_mode=pl.Buffered(1))
    vec_spec = pl.BlockSpec((1, D), lambda b, i: (0, 0), pipeline_mode=pl.Buffered(1))

    # --- VMEM budget: estimate from tile sizes, cap at 75% of physical VMEM. ---
    itemsize = query.dtype.itemsize
    est = 0
    est += 2 * tq * D * itemsize                 # query tile (double-buffered)
    est += 2 * 2 * Sk * D * itemsize             # raw key + value blocks (double-buffered)
    est += 2 * tq * D * itemsize                 # output tile (double-buffered)
    est += 4 * D * D * itemsize                  # 4 DxD weights (single-buffered)
    est += 6 * D * itemsize                      # biases + LN params (single-buffered)
    est += (2 * Sk * D + 2 * tq * D) * itemsize  # scratch: K/V caches + q/ctx scratch
    est += (tq * D + 2 * Sk * D) * 4             # f32 projection temporaries
    est += 2 * tq * Sk * 4                       # f32 scores + exp(p) (per head, reused)
    est += 2 * tq * D * 4                        # f32 out-proj / residual temporaries
    est = int(est * 1.25)                        # headroom for compiler scratch

    try:
        phys_vmem = pltpu.get_tpu_info().vmem_capacity_bytes
    except Exception:
        phys_vmem = 128 * 1024 * 1024            # v5e/v6e default
    vmem_cap = (phys_vmem * 3) // 4              # ~48 MiB on v7x, ~96 MiB on v5e/v6e
    vmem_limit = int(min(vmem_cap, max(est, 16 * 1024 * 1024)))

    return pl.pallas_call(
        kernel,
        out_shape=jax.ShapeDtypeStruct((B, Sq, D), query.dtype),
        grid_spec=pltpu.PrefetchScalarGridSpec(
            num_scalar_prefetch=0,
            grid=(B, n_q_tiles),
            in_specs=[
                q_spec,                  # query
                kv_spec,                 # key
                kv_spec,                 # value
                mat_spec, vec_spec,      # w_q, b_q  (pre-scaled by 1/sqrt(d_k))
                mat_spec, vec_spec,      # w_k, b_k
                mat_spec, vec_spec,      # w_v, b_v
                mat_spec, vec_spec,      # w_o, b_o
                vec_spec, vec_spec,      # ln gamma, ln beta
            ],
            out_specs=q_spec,
            scratch_shapes=[
                pltpu.VMEM((Sk, D), dt),     # K projection cache (per batch element)
                pltpu.VMEM((Sk, D), dt),     # V projection cache
                pltpu.VMEM((tq, D), dt),     # Q projection (per tile)
                pltpu.VMEM((tq, D), dt),     # assembled per-head contexts
            ],
        ),
        compiler_params=pltpu.CompilerParams(
            # q-tile axis is "arbitrary": the K/V scratch caches carry across it.
            dimension_semantics=("parallel", "arbitrary"),
            vmem_limit_bytes=vmem_limit),
    )(query, key, value,
      params["w_q"], params["b_q"],
      params["w_k"], params["b_k"],
      params["w_v"], params["b_v"],
      params["w_o"], params["b_o"],
      params["ln_gamma"], params["ln_beta"])


def _reference(query, key, value, params, *, n_heads):
    """Pure-JAX reference mirroring the PyTorch forward (eval mode, mask=None).

    Uses the RAW (unscaled) parameters, like the PyTorch module."""
    B, Sq, D = query.shape
    Sk = key.shape[1]
    d_k = D // n_heads

    def lin(x, w, b):
        return jnp.einsum("bsd,de->bse", x, w) + b[0]

    Q = lin(query, params["w_q"], params["b_q"]).reshape(B, Sq, n_heads, d_k).transpose(0, 2, 1, 3)
    K = lin(key, params["w_k"], params["b_k"]).reshape(B, Sk, n_heads, d_k).transpose(0, 2, 1, 3)
    V = lin(value, params["w_v"], params["b_v"]).reshape(B, Sk, n_heads, d_k).transpose(0, 2, 1, 3)

    scores = jnp.einsum("bhqd,bhkd->bhqk", Q, K) / math.sqrt(d_k)
    attn = jax.nn.softmax(scores, axis=-1)
    ctx = jnp.einsum("bhqk,bhkd->bhqd", attn, V).transpose(0, 2, 1, 3).reshape(B, Sq, D)
    out = lin(ctx, params["w_o"], params["b_o"])
    resid = out + query
    mean = jnp.mean(resid, axis=-1, keepdims=True)
    var = jnp.mean((resid - mean) ** 2, axis=-1, keepdims=True)
    normed = (resid - mean) / jnp.sqrt(var + 1e-5)
    return normed * params["ln_gamma"][0] + params["ln_beta"][0]


def init_params(key, d_model):
    ks = jax.random.split(key, 8)
    scale = 1.0 / math.sqrt(d_model)

    def w(k):
        return jax.random.uniform(k, (d_model, d_model), jnp.float32,
                                  minval=-scale, maxval=scale)

    def b(k):
        return jax.random.uniform(k, (1, d_model), jnp.float32,
                                  minval=-scale, maxval=scale)

    return {
        "w_q": w(ks[0]), "b_q": b(ks[1]),
        "w_k": w(ks[2]), "b_k": b(ks[3]),
        "w_v": w(ks[4]), "b_v": b(ks[5]),
        "w_o": w(ks[6]), "b_o": b(ks[7]),
        "ln_gamma": jnp.ones((1, d_model), jnp.float32),
        "ln_beta": jnp.zeros((1, d_model), jnp.float32),
    }


if __name__ == "__main__":
    B, Sq, Sk, D, H = 2, 8, 8, 32, 4

    root = jax.random.PRNGKey(0)
    kq, kk, kv, kp, kq2 = jax.random.split(root, 5)
    query = jax.random.normal(kq, (B, Sq, D), jnp.float32)
    key_t = jax.random.normal(kk, (B, Sk, D), jnp.float32)
    value = jax.random.normal(kv, (B, Sk, D), jnp.float32)
    params = init_params(kp, D)
    kparams = prepare_params(params, n_heads=H)   # one-time host-side scale fold

    # Tolerance accounts for the EUP approximate reciprocal in the softmax
    # normalization (pl.reciprocal(..., approx=True)); real bugs produce
    # errors orders of magnitude larger.
    TOL = 5e-3

    # Case 1: single query tile per batch element.
    out = multi_head_cross_attention(query, key_t, value, kparams, n_heads=H)
    out = jax.block_until_ready(out)
    ref = _reference(query, key_t, value, params, n_heads=H)
    np.testing.assert_allclose(np.asarray(out), np.asarray(ref), rtol=TOL, atol=TOL)

    # Case 2: multiple query tiles per batch element -> exercises the cached
    # K/V projection path (pl.when on the first q-tile only).
    Sq2 = 16
    query2 = jax.random.normal(kq2, (B, Sq2, D), jnp.float32)
    out2 = multi_head_cross_attention(query2, key_t, value, kparams, n_heads=H, tq_max=8)
    out2 = jax.block_until_ready(out2)
    ref2 = _reference(query2, key_t, value, params, n_heads=H)
    np.testing.assert_allclose(np.asarray(out2), np.asarray(ref2), rtol=TOL, atol=TOL)

    print("KERNEL_OK")
</pallas_src>

<mosaic_0001>
module attributes {stable_mosaic.version = 11 : i64} {
  func.func @_mhca_kernel(%arg0: i32, %arg1: i32, %arg2: memref<1x8x32xf32, #tpu.memory_space<vmem>>, %arg3: memref<1x8x32xf32, #tpu.memory_space<vmem>>, %arg4: memref<1x8x32xf32, #tpu.memory_space<vmem>>, %arg5: memref<32x32xf32, #tpu.memory_space<vmem>>, %arg6: memref<1x32xf32, #tpu.memory_space<vmem>>, %arg7: memref<32x32xf32, #tpu.memory_space<vmem>>, %arg8: memref<1x32xf32, #tpu.memory_space<vmem>>, %arg9: memref<32x32xf32, #tpu.memory_space<vmem>>, %arg10: memref<1x32xf32, #tpu.memory_space<vmem>>, %arg11: memref<32x32xf32, #tpu.memory_space<vmem>>, %arg12: memref<1x32xf32, #tpu.memory_space<vmem>>, %arg13: memref<1x32xf32, #tpu.memory_space<vmem>>, %arg14: memref<1x32xf32, #tpu.memory_space<vmem>>, %arg15: memref<1x8x32xf32, #tpu.memory_space<vmem>>, %arg16: memref<8x32xf32, #tpu.memory_space<vmem>>, %arg17: memref<8x32xf32, #tpu.memory_space<vmem>>, %arg18: memref<8x32xf32, #tpu.memory_space<vmem>>, %arg19: memref<8x32xf32, #tpu.memory_space<vmem>>) attributes {dimension_semantics = [#tpu.dimension_semantics<parallel>, #tpu.dimension_semantics<arbitrary>], iteration_bounds = array<i64: 2, 1>, scalar_prefetch = 0 : i64, scratch_operands = 4 : i64, tpu.core_type = #tpu.core_type<tc>, window_params = [{transform_indices = @transform_0, window_bounds = array<i64: 1, 8, 32>}, {transform_indices = @transform_1, window_bounds = array<i64: 1, 8, 32>}, {transform_indices = @transform_2, window_bounds = array<i64: 1, 8, 32>}, {pipeline_mode = #tpu.pipeline_mode<synchronous>, transform_indices = @transform_3, window_bounds = array<i64: 32, 32>}, {pipeline_mode = #tpu.pipeline_mode<synchronous>, transform_indices = @transform_4, window_bounds = array<i64: 1, 32>}, {pipeline_mode = #tpu.pipeline_mode<synchronous>, transform_indices = @transform_5, window_bounds = array<i64: 32, 32>}, {pipeline_mode = #tpu.pipeline_mode<synchronous>, transform_indices = @transform_6, window_bounds = array<i64: 1, 32>}, {pipeline_mode = #tpu.pipeline_mode<synchronous>, transform_indices = @transform_7, window_bounds = array<i64: 32, 32>}, {pipeline_mode = #tpu.pipeline_mode<synchronous>, transform_indices = @transform_8, window_bounds = array<i64: 1, 32>}, {pipeline_mode = #tpu.pipeline_mode<synchronous>, transform_indices = @transform_9, window_bounds = array<i64: 32, 32>}, {pipeline_mode = #tpu.pipeline_mode<synchronous>, transform_indices = @transform_10, window_bounds = array<i64: 1, 32>}, {pipeline_mode = #tpu.pipeline_mode<synchronous>, transform_indices = @transform_11, window_bounds = array<i64: 1, 32>}, {pipeline_mode = #tpu.pipeline_mode<synchronous>, transform_indices = @transform_12, window_bounds = array<i64: 1, 32>}, {transform_indices = @transform_13, window_bounds = array<i64: 1, 8, 32>}]} {
    %c0_i32 = arith.constant 0 : i32
    %0 = arith.cmpi eq, %arg1, %c0_i32 : i32
    %1 = arith.extui %0 : i1 to i32
    %c0_i32_0 = arith.constant 0 : i32
    %2 = arith.cmpi ne, %1, %c0_i32_0 : i32
    scf.if %2 {
      %c0_73 = arith.constant 0 : index
      %c0_74 = arith.constant 0 : index
      %c0_75 = arith.constant 0 : index
      %109 = vector.load %arg3[%c0_73, %c0_74, %c0_75] : memref<1x8x32xf32, #tpu.memory_space<vmem>>, vector<1x8x32xf32>
      %110 = vector.shape_cast %109 : vector<1x8x32xf32> to vector<8x32xf32>
      %c0_76 = arith.constant 0 : index
      %c0_77 = arith.constant 0 : index
      %111 = vector.load %arg7[%c0_76, %c0_77] : memref<32x32xf32, #tpu.memory_space<vmem>>, vector<32x32xf32>
      %cst_78 = arith.constant dense<0.000000e+00> : vector<8x32xf32>
      %112 = tpu.matmul %110, %111, %cst_78 {dimension_numbers = #tpu.dot_dimension_numbers<[1], [0], [0], [1], [0, 0, 1, 1], [], []>} : vector<8x32xf32>, vector<32x32xf32>, vector<8x32xf32> -> vector<8x32xf32>
      %c0_79 = arith.constant 0 : index
      %c0_80 = arith.constant 0 : index
      %113 = vector.load %arg8[%c0_79, %c0_80] : memref<1x32xf32, #tpu.memory_space<vmem>>, vector<1x32xf32>
      %114 = vector.broadcast %113 : vector<1x32xf32> to vector<8x32xf32>
      %115 = arith.addf %112, %114 : vector<8x32xf32>
      %c0_81 = arith.constant 0 : index
      %c0_82 = arith.constant 0 : index
      %c0_83 = arith.constant 0 : index
      %116 = vector.load %arg4[%c0_81, %c0_82, %c0_83] : memref<1x8x32xf32, #tpu.memory_space<vmem>>, vector<1x8x32xf32>
      %117 = vector.shape_cast %116 : vector<1x8x32xf32> to vector<8x32xf32>
      %c0_84 = arith.constant 0 : index
      %c0_85 = arith.constant 0 : index
      %118 = vector.load %arg9[%c0_84, %c0_85] : memref<32x32xf32, #tpu.memory_space<vmem>>, vector<32x32xf32>
      %cst_86 = arith.constant dense<0.000000e+00> : vector<8x32xf32>
      %119 = tpu.matmul %117, %118, %cst_86 {dimension_numbers = #tpu.dot_dimension_numbers<[1], [0], [0], [1], [0, 0, 1, 1], [], []>} : vector<8x32xf32>, vector<32x32xf32>, vector<8x32xf32> -> vector<8x32xf32>
      %c0_87 = arith.constant 0 : index
      %c0_88 = arith.constant 0 : index
      %120 = vector.load %arg10[%c0_87, %c0_88] : memref<1x32xf32, #tpu.memory_space<vmem>>, vector<1x32xf32>
      %121 = vector.broadcast %120 : vector<1x32xf32> to vector<8x32xf32>
      %122 = arith.addf %119, %121 : vector<8x32xf32>
      %c0_89 = arith.constant 0 : index
      %c0_90 = arith.constant 0 : index
      %123 = vector.load %arg16[%c0_89, %c0_90] : memref<8x32xf32, #tpu.memory_space<vmem>>, vector<8x32xf32>
      tpu.vector_store %arg16[%c0_89, %c0_90], %115 {strides = array<i32>} : memref<8x32xf32, #tpu.memory_space<vmem>>, vector<8x32xf32>,
      %c0_91 = arith.constant 0 : index
      %c0_92 = arith.constant 0 : index
      %124 = vector.load %arg17[%c0_91, %c0_92] : memref<8x32xf32, #tpu.memory_space<vmem>>, vector<8x32xf32>
      tpu.vector_store %arg17[%c0_91, %c0_92], %122 {strides = array<i32>} : memref<8x32xf32, #tpu.memory_space<vmem>>, vector<8x32xf32>,
    } else {
    }
    %c0 = arith.constant 0 : index
    %c0_1 = arith.constant 0 : index
    %c0_2 = arith.constant 0 : index
    %3 = vector.load %arg2[%c0, %c0_1, %c0_2] : memref<1x8x32xf32, #tpu.memory_space<vmem>>, vector<1x8x32xf32>
    %4 = vector.shape_cast %3 : vector<1x8x32xf32> to vector<8x32xf32>
    %c0_3 = arith.constant 0 : index
    %c0_4 = arith.constant 0 : index
    %5 = vector.load %arg5[%c0_3, %c0_4] : memref<32x32xf32, #tpu.memory_space<vmem>>, vector<32x32xf32>
    %cst = arith.constant dense<0.000000e+00> : vector<8x32xf32>
    %6 = tpu.matmul %4, %5, %cst {dimension_numbers = #tpu.dot_dimension_numbers<[1], [0], [0], [1], [0, 0, 1, 1], [], []>} : vector<8x32xf32>, vector<32x32xf32>, vector<8x32xf32> -> vector<8x32xf32>
    %c0_5 = arith.constant 0 : index
    %c0_6 = arith.constant 0 : index
    %7 = vector.load %arg6[%c0_5, %c0_6] : memref<1x32xf32, #tpu.memory_space<vmem>>, vector<1x32xf32>
    %8 = vector.broadcast %7 : vector<1x32xf32> to vector<8x32xf32>
    %9 = arith.addf %6, %8 : vector<8x32xf32>
    %c0_7 = arith.constant 0 : index
    %c0_8 = arith.constant 0 : index
    %10 = vector.load %arg18[%c0_7, %c0_8] : memref<8x32xf32, #tpu.memory_space<vmem>>, vector<8x32xf32>
    tpu.vector_store %arg18[%c0_7, %c0_8], %9 {strides = array<i32>} : memref<8x32xf32, #tpu.memory_space<vmem>>, vector<8x32xf32>,
    %c0_9 = arith.constant 0 : index
    %c0_10 = arith.constant 0 : index
    %11 = vector.load %arg18[%c0_9, %c0_10] : memref<8x32xf32, #tpu.memory_space<vmem>>, vector<8x8xf32>
    %c0_11 = arith.constant 0 : index
    %c0_12 = arith.constant 0 : index
    %12 = vector.load %arg16[%c0_11, %c0_12] : memref<8x32xf32, #tpu.memory_space<vmem>>, vector<8x8xf32>
    %c0_13 = arith.constant 0 : index
    %c0_14 = arith.constant 0 : index
    %13 = vector.load %arg17[%c0_13, %c0_14] : memref<8x32xf32, #tpu.memory_space<vmem>>, vector<8x8xf32>
    %cst_15 = arith.constant dense<0.000000e+00> : vector<8x8xf32>
    %14 = tpu.matmul %11, %12, %cst_15 {dimension_numbers = #tpu.dot_dimension_numbers<[1], [1], [0], [0], [0, 0, 1, 0], [], []>} : vector<8x8xf32>, vector<8x8xf32>, vector<8x8xf32> -> vector<8x8xf32>
    %cst_16 = arith.constant dense<0xFF800000> : vector<8xf32>
    %15 = vector.multi_reduction <maximumf>, %14, %cst_16 [1] : vector<8x8xf32> to vector<8xf32>
    %16 = vector.shape_cast %15 : vector<8xf32> to vector<8x1xf32>
    %17 = vector.broadcast %16 : vector<8x1xf32> to vector<8x8xf32>
    %18 = arith.subf %14, %17 : vector<8x8xf32>
    %19 = math.exp %18 : vector<8x8xf32>
    %cst_17 = arith.constant dense<0.000000e+00> : vector<8xf32>
    %20 = vector.multi_reduction <add>, %19, %cst_17 [1] : vector<8x8xf32> to vector<8xf32>
    %21 = vector.shape_cast %20 : vector<8xf32> to vector<8x1xf32>
    %cst_18 = arith.constant dense<0.000000e+00> : vector<8x8xf32>
    %22 = tpu.matmul %19, %13, %cst_18 {dimension_numbers = #tpu.dot_dimension_numbers<[1], [0], [0], [1], [0, 0, 1, 1], [], []>} : vector<8x8xf32>, vector<8x8xf32>, vector<8x8xf32> -> vector<8x8xf32>
    %23 = tpu.reciprocal %21 {approx = true} : vector<8x1xf32> -> vector<8x1xf32>
    %24 = vector.broadcast %23 : vector<8x1xf32> to vector<8x8xf32>
    %25 = arith.mulf %22, %24 : vector<8x8xf32>
    %c0_19 = arith.constant 0 : index
    %c0_20 = arith.constant 0 : index
    %26 = vector.load %arg19[%c0_19, %c0_20] : memref<8x32xf32, #tpu.memory_space<vmem>>, vector<8x8xf32>
    tpu.vector_store %arg19[%c0_19, %c0_20], %25 {strides = array<i32>} : memref<8x32xf32, #tpu.memory_space<vmem>>, vector<8x8xf32>,
    %c0_21 = arith.constant 0 : index
    %c8 = arith.constant 8 : index
    %27 = vector.load %arg18[%c0_21, %c8] : memref<8x32xf32, #tpu.memory_space<vmem>>, vector<8x8xf32>
    %c0_22 = arith.constant 0 : index
    %c8_23 = arith.constant 8 : index
    %28 = vector.load %arg16[%c0_22, %c8_23] : memref<8x32xf32, #tpu.memory_space<vmem>>, vector<8x8xf32>
    %c0_24 = arith.constant 0 : index
    %c8_25 = arith.constant 8 : index
    %29 = vector.load %arg17[%c0_24, %c8_25] : memref<8x32xf32, #tpu.memory_space<vmem>>, vector<8x8xf32>
    %cst_26 = arith.constant dense<0.000000e+00> : vector<8x8xf32>
    %30 = tpu.matmul %27, %28, %cst_26 {dimension_numbers = #tpu.dot_dimension_numbers<[1], [1], [0], [0], [0, 0, 1, 0], [], []>} : vector<8x8xf32>, vector<8x8xf32>, vector<8x8xf32> -> vector<8x8xf32>
    %cst_27 = arith.constant dense<0xFF800000> : vector<8xf32>
    %31 = vector.multi_reduction <maximumf>, %30, %cst_27 [1] : vector<8x8xf32> to vector<8xf32>
    %32 = vector.shape_cast %31 : vector<8xf32> to vector<8x1xf32>
    %33 = vector.broadcast %32 : vector<8x1xf32> to vector<8x8xf32>
    %34 = arith.subf %30, %33 : vector<8x8xf32>
    %35 = math.exp %34 : vector<8x8xf32>
    %cst_28 = arith.constant dense<0.000000e+00> : vector<8xf32>
    %36 = vector.multi_reduction <add>, %35, %cst_28 [1] : vector<8x8xf32> to vector<8xf32>
    %37 = vector.shape_cast %36 : vector<8xf32> to vector<8x1xf32>
    %cst_29 = arith.constant dense<0.000000e+00> : vector<8x8xf32>
    %38 = tpu.matmul %35, %29, %cst_29 {dimension_numbers = #tpu.dot_dimension_numbers<[1], [0], [0], [1], [0, 0, 1, 1], [], []>} : vector<8x8xf32>, vector<8x8xf32>, vector<8x8xf32> -> vector<8x8xf32>
    %39 = tpu.reciprocal %37 {approx = true} : vector<8x1xf32> -> vector<8x1xf32>
    %40 = vector.broadcast %39 : vector<8x1xf32> to vector<8x8xf32>
    %41 = arith.mulf %38, %40 : vector<8x8xf32>
    %c0_30 = arith.constant 0 : index
    %c8_31 = arith.constant 8 : index
    %42 = vector.load %arg19[%c0_30, %c8_31] : memref<8x32xf32, #tpu.memory_space<vmem>>, vector<8x8xf32>
    tpu.vector_store %arg19[%c0_30, %c8_31], %41 {strides = array<i32>} : memref<8x32xf32, #tpu.memory_space<vmem>>, vector<8x8xf32>,
    %c0_32 = arith.constant 0 : index
    %c16 = arith.constant 16 : index
    %43 = vector.load %arg18[%c0_32, %c16] : memref<8x32xf32, #tpu.memory_space<vmem>>, vector<8x8xf32>
    %c0_33 = arith.constant 0 : index
    %c16_34 = arith.constant 16 : index
    %44 = vector.load %arg16[%c0_33, %c16_34] : memref<8x32xf32, #tpu.memory_space<vmem>>, vector<8x8xf32>
    %c0_35 = arith.constant 0 : index
    %c16_36 = arith.constant 16 : index
    %45 = vector.load %arg17[%c0_35, %c16_36] : memref<8x32xf32, #tpu.memory_space<vmem>>, vector<8x8xf32>
    %cst_37 = arith.constant dense<0.000000e+00> : vector<8x8xf32>
    %46 = tpu.matmul %43, %44, %cst_37 {dimension_numbers = #tpu.dot_dimension_numbers<[1], [1], [0], [0], [0, 0, 1, 0], [], []>} : vector<8x8xf32>, vector<8x8xf32>, vector<8x8xf32> -> vector<8x8xf32>
    %cst_38 = arith.constant dense<0xFF800000> : vector<8xf32>
    %47 = vector.multi_reduction <maximumf>, %46, %cst_38 [1] : vector<8x8xf32> to vector<8xf32>
    %48 = vector.shape_cast %47 : vector<8xf32> to vector<8x1xf32>
    %49 = vector.broadcast %48 : vector<8x1xf32> to vector<8x8xf32>
    %50 = arith.subf %46, %49 : vector<8x8xf32>
    %51 = math.exp %50 : vector<8x8xf32>
    %cst_39 = arith.constant dense<0.000000e+00> : vector<8xf32>
    %52 = vector.multi_reduction <add>, %51, %cst_39 [1] : vector<8x8xf32> to vector<8xf32>
    %53 = vector.shape_cast %52 : vector<8xf32> to vector<8x1xf32>
    %cst_40 = arith.constant dense<0.000000e+00> : vector<8x8xf32>
    %54 = tpu.matmul %51, %45, %cst_40 {dimension_numbers = #tpu.dot_dimension_numbers<[1], [0], [0], [1], [0, 0, 1, 1], [], []>} : vector<8x8xf32>, vector<8x8xf32>, vector<8x8xf32> -> vector<8x8xf32>
    %55 = tpu.reciprocal %53 {approx = true} : vector<8x1xf32> -> vector<8x1xf32>
    %56 = vector.broadcast %55 : vector<8x1xf32> to vector<8x8xf32>
    %57 = arith.mulf %54, %56 : vector<8x8xf32>
    %c0_41 = arith.constant 0 : index
    %c16_42 = arith.constant 16 : index
    %58 = vector.load %arg19[%c0_41, %c16_42] : memref<8x32xf32, #tpu.memory_space<vmem>>, vector<8x8xf32>
    tpu.vector_store %arg19[%c0_41, %c16_42], %57 {strides = array<i32>} : memref<8x32xf32, #tpu.memory_space<vmem>>, vector<8x8xf32>,
    %c0_43 = arith.constant 0 : index
    %c24 = arith.constant 24 : index
    %59 = vector.load %arg18[%c0_43, %c24] : memref<8x32xf32, #tpu.memory_space<vmem>>, vector<8x8xf32>
    %c0_44 = arith.constant 0 : index
    %c24_45 = arith.constant 24 : index
    %60 = vector.load %arg16[%c0_44, %c24_45] : memref<8x32xf32, #tpu.memory_space<vmem>>, vector<8x8xf32>
    %c0_46 = arith.constant 0 : index
    %c24_47 = arith.constant 24 : index
    %61 = vector.load %arg17[%c0_46, %c24_47] : memref<8x32xf32, #tpu.memory_space<vmem>>, vector<8x8xf32>
    %cst_48 = arith.constant dense<0.000000e+00> : vector<8x8xf32>
    %62 = tpu.matmul %59, %60, %cst_48 {dimension_numbers = #tpu.dot_dimension_numbers<[1], [1], [0], [0], [0, 0, 1, 0], [], []>} : vector<8x8xf32>, vector<8x8xf32>, vector<8x8xf32> -> vector<8x8xf32>
    %cst_49 = arith.constant dense<0xFF800000> : vector<8xf32>
    %63 = vector.multi_reduction <maximumf>, %62, %cst_49 [1] : vector<8x8xf32> to vector<8xf32>
    %64 = vector.shape_cast %63 : vector<8xf32> to vector<8x1xf32>
    %65 = vector.broadcast %64 : vector<8x1xf32> to vector<8x8xf32>
    %66 = arith.subf %62, %65 : vector<8x8xf32>
    %67 = math.exp %66 : vector<8x8xf32>
    %cst_50 = arith.constant dense<0.000000e+00> : vector<8xf32>
    %68 = vector.multi_reduction <add>, %67, %cst_50 [1] : vector<8x8xf32> to vector<8xf32>
    %69 = vector.shape_cast %68 : vector<8xf32> to vector<8x1xf32>
    %cst_51 = arith.constant dense<0.000000e+00> : vector<8x8xf32>
    %70 = tpu.matmul %67, %61, %cst_51 {dimension_numbers = #tpu.dot_dimension_numbers<[1], [0], [0], [1], [0, 0, 1, 1], [], []>} : vector<8x8xf32>, vector<8x8xf32>, vector<8x8xf32> -> vector<8x8xf32>
    %71 = tpu.reciprocal %69 {approx = true} : vector<8x1xf32> -> vector<8x1xf32>
    %72 = vector.broadcast %71 : vector<8x1xf32> to vector<8x8xf32>
    %73 = arith.mulf %70, %72 : vector<8x8xf32>
    %c0_52 = arith.constant 0 : index
    %c24_53 = arith.constant 24 : index
    %74 = vector.load %arg19[%c0_52, %c24_53] : memref<8x32xf32, #tpu.memory_space<vmem>>, vector<8x8xf32>
    tpu.vector_store %arg19[%c0_52, %c24_53], %73 {strides = array<i32>} : memref<8x32xf32, #tpu.memory_space<vmem>>, vector<8x8xf32>,
    %c0_54 = arith.constant 0 : index
    %c0_55 = arith.constant 0 : index
    %75 = vector.load %arg19[%c0_54, %c0_55] : memref<8x32xf32, #tpu.memory_space<vmem>>, vector<8x32xf32>
    %c0_56 = arith.constant 0 : index
    %c0_57 = arith.constant 0 : index
    %76 = vector.load %arg11[%c0_56, %c0_57] : memref<32x32xf32, #tpu.memory_space<vmem>>, vector<32x32xf32>
    %cst_58 = arith.constant dense<0.000000e+00> : vector<8x32xf32>
    %77 = tpu.matmul %75, %76, %cst_58 {dimension_numbers = #tpu.dot_dimension_numbers<[1], [0], [0], [1], [0, 0, 1, 1], [], []>} : vector<8x32xf32>, vector<32x32xf32>, vector<8x32xf32> -> vector<8x32xf32>
    %c0_59 = arith.constant 0 : index
    %c0_60 = arith.constant 0 : index
    %78 = vector.load %arg12[%c0_59, %c0_60] : memref<1x32xf32, #tpu.memory_space<vmem>>, vector<1x32xf32>
    %79 = vector.broadcast %78 : vector<1x32xf32> to vector<8x32xf32>
    %80 = arith.addf %77, %79 : vector<8x32xf32>
    %81 = arith.addf %80, %4 : vector<8x32xf32>
    %cst_61 = arith.constant dense<0.000000e+00> : vector<8xf32>
    %82 = vector.multi_reduction <add>, %81, %cst_61 [1] : vector<8x32xf32> to vector<8xf32>
    %83 = vector.shape_cast %82 : vector<8xf32> to vector<8x1xf32>
    %cst_62 = arith.constant 3.200000e+01 : f32
    %84 = vector.broadcast %cst_62 : f32 to vector<8x1xf32>
    %85 = arith.divf %83, %84 : vector<8x1xf32>
    %86 = vector.broadcast %85 : vector<8x1xf32> to vector<8x32xf32>
    %87 = arith.subf %81, %86 : vector<8x32xf32>
    %88 = arith.mulf %87, %87 : vector<8x32xf32>
    %cst_63 = arith.constant dense<0.000000e+00> : vector<8xf32>
    %89 = vector.multi_reduction <add>, %88, %cst_63 [1] : vector<8x32xf32> to vector<8xf32>
    %90 = vector.shape_cast %89 : vector<8xf32> to vector<8x1xf32>
    %cst_64 = arith.constant 3.200000e+01 : f32
    %91 = vector.broadcast %cst_64 : f32 to vector<8x1xf32>
    %92 = arith.divf %90, %91 : vector<8x1xf32>
    %93 = vector.broadcast %85 : vector<8x1xf32> to vector<8x32xf32>
    %94 = arith.subf %81, %93 : vector<8x32xf32>
    %cst_65 = arith.constant 9.99999974E-6 : f32
    %95 = vector.broadcast %cst_65 : f32 to vector<8x1xf32>
    %96 = arith.addf %92, %95 : vector<8x1xf32>
    %97 = math.rsqrt %96 : vector<8x1xf32>
    %98 = vector.broadcast %97 : vector<8x1xf32> to vector<8x32xf32>
    %99 = arith.mulf %94, %98 : vector<8x32xf32>
    %c0_66 = arith.constant 0 : index
    %c0_67 = arith.constant 0 : index
    %100 = vector.load %arg13[%c0_66, %c0_67] : memref<1x32xf32, #tpu.memory_space<vmem>>, vector<1x32xf32>
    %101 = vector.broadcast %100 : vector<1x32xf32> to vector<8x32xf32>
    %102 = arith.mulf %99, %101 : vector<8x32xf32>
    %c0_68 = arith.constant 0 : index
    %c0_69 = arith.constant 0 : index
    %103 = vector.load %arg14[%c0_68, %c0_69] : memref<1x32xf32, #tpu.memory_space<vmem>>, vector<1x32xf32>
    %104 = vector.broadcast %103 : vector<1x32xf32> to vector<8x32xf32>
    %105 = arith.addf %102, %104 : vector<8x32xf32>
    %c0_70 = arith.constant 0 : index
    %c0_71 = arith.constant 0 : index
    %c0_72 = arith.constant 0 : index
    %106 = vector.load %arg15[%c0_70, %c0_71, %c0_72] : memref<1x8x32xf32, #tpu.memory_space<vmem>>, vector<1x8x32xf32>
    %107 = vector.shape_cast %106 : vector<1x8x32xf32> to vector<8x32xf32>
    %108 = vector.shape_cast %105 : vector<8x32xf32> to vector<1x8x32xf32>
    tpu.vector_store %arg15[%c0_70, %c0_71, %c0_72], %108 {strides = array<i32>} : memref<1x8x32xf32, #tpu.memory_space<vmem>>, vector<1x8x32xf32>,
    return
  }
  func.func @transform_0(%arg0: i32, %arg1: i32) -> (i32, i32, i32) {
    %c0_i32 = arith.constant 0 : i32
    %c0_i32_0 = arith.constant 0 : i32
    return %arg0, %arg1, %c0_i32 : i32, i32, i32
  }
  func.func @transform_1(%arg0: i32, %arg1: i32) -> (i32, i32, i32) {
    %c0_i32 = arith.constant 0 : i32
    %c0_i32_0 = arith.constant 0 : i32
    %c0_i32_1 = arith.constant 0 : i32
    return %arg0, %c0_i32, %c0_i32_0 : i32, i32, i32
  }
  func.func @transform_2(%arg0: i32, %arg1: i32) -> (i32, i32, i32) {
    %c0_i32 = arith.constant 0 : i32
    %c0_i32_0 = arith.constant 0 : i32
    %c0_i32_1 = arith.constant 0 : i32
    return %arg0, %c0_i32, %c0_i32_0 : i32, i32, i32
  }
  func.func @transform_3(%arg0: i32, %arg1: i32) -> (i32, i32) {
    %c0_i32 = arith.constant 0 : i32
    %c0_i32_0 = arith.constant 0 : i32
    %c0_i32_1 = arith.constant 0 : i32
    return %c0_i32, %c0_i32_0 : i32, i32
  }
  func.func @transform_4(%arg0: i32, %arg1: i32) -> (i32, i32) {
    %c0_i32 = arith.constant 0 : i32
    %c0_i32_0 = arith.constant 0 : i32
    %c0_i32_1 = arith.constant 0 : i32
    return %c0_i32, %c0_i32_0 : i32, i32
  }
  func.func @transform_5(%arg0: i32, %arg1: i32) -> (i32, i32) {
    %c0_i32 = arith.constant 0 : i32
    %c0_i32_0 = arith.constant 0 : i32
    %c0_i32_1 = arith.constant 0 : i32
    return %c0_i32, %c0_i32_0 : i32, i32
  }
  func.func @transform_6(%arg0: i32, %arg1: i32) -> (i32, i32) {
    %c0_i32 = arith.constant 0 : i32
    %c0_i32_0 = arith.constant 0 : i32
    %c0_i32_1 = arith.constant 0 : i32
    return %c0_i32, %c0_i32_0 : i32, i32
  }
  func.func @transform_7(%arg0: i32, %arg1: i32) -> (i32, i32) {
    %c0_i32 = arith.constant 0 : i32
    %c0_i32_0 = arith.constant 0 : i32
    %c0_i32_1 = arith.constant 0 : i32
    return %c0_i32, %c0_i32_0 : i32, i32
  }
  func.func @transform_8(%arg0: i32, %arg1: i32) -> (i32, i32) {
    %c0_i32 = arith.constant 0 : i32
    %c0_i32_0 = arith.constant 0 : i32
    %c0_i32_1 = arith.constant 0 : i32
    return %c0_i32, %c0_i32_0 : i32, i32
  }
  func.func @transform_9(%arg0: i32, %arg1: i32) -> (i32, i32) {
    %c0_i32 = arith.constant 0 : i32
    %c0_i32_0 = arith.constant 0 : i32
    %c0_i32_1 = arith.constant 0 : i32
    return %c0_i32, %c0_i32_0 : i32, i32
  }
  func.func @transform_10(%arg0: i32, %arg1: i32) -> (i32, i32) {
    %c0_i32 = arith.constant 0 : i32
    %c0_i32_0 = arith.constant 0 : i32
    %c0_i32_1 = arith.constant 0 : i32
    return %c0_i32, %c0_i32_0 : i32, i32
  }
  func.func @transform_11(%arg0: i32, %arg1: i32) -> (i32, i32) {
    %c0_i32 = arith.constant 0 : i32
    %c0_i32_0 = arith.constant 0 : i32
    %c0_i32_1 = arith.constant 0 : i32
    return %c0_i32, %c0_i32_0 : i32, i32
  }
  func.func @transform_12(%arg0: i32, %arg1: i32) -> (i32, i32) {
    %c0_i32 = arith.constant 0 : i32
    %c0_i32_0 = arith.constant 0 : i32
    %c0_i32_1 = arith.constant 0 : i32
    return %c0_i32, %c0_i32_0 : i32, i32
  }
  func.func @transform_13(%arg0: i32, %arg1: i32) -> (i32, i32, i32) {
    %c0_i32 = arith.constant 0 : i32
    %c0_i32_0 = arith.constant 0 : i32
    return %arg0, %arg1, %c0_i32 : i32, i32, i32
  }
}

</mosaic_0001>

<bundles_post_ra>
// kernel: tpu_custom_call.1
= control target key start
LH: loop header
LB: loop body
LE: loop exit
PB: predicated region body
PF: predicated region fallthrough
CT: control target
= control target key end

     0   :  { %s3066_s0 = inlined_call_operand.hbm [shape: f32[2,8,32], index: 0, kind: input, shape index: {}]   ;;  %s3067_s1 = inlined_call_operand.hbm [shape: f32[2,8,32], index: 1, kind: input, shape index: {}]   ;;  %s3068_s2 = inlined_call_operand.hbm [shape: f32[2,8,32], index: 2, kind: input, shape index: {}]   ;;  %s3069_s3 = inlined_call_operand.hbm [shape: f32[32,32], index: 3, kind: input, shape index: {}]   ;;  %s3070_s4 = inlined_call_operand.vmem [shape: f32[1,32], index: 4, kind: input, shape index: {}]   ;;  %s3071_s5 = inlined_call_operand.hbm [shape: f32[32,32], index: 5, kind: input, shape index: {}]   ;;  %s3072_s6 = inlined_call_operand.vmem [shape: f32[1,32], index: 6, kind: input, shape index: {}]   ;;  %s3073_s7 = inlined_call_operand.hbm [shape: f32[32,32], index: 7, kind: input, shape index: {}]   ;;  %s3074_s8 = inlined_call_operand.hbm [shape: f32[1,32], index: 8, kind: input, shape index: {}]   ;;  %s3075_s9 = inlined_call_operand.vmem [shape: f32[32,32], index: 9, kind: input, shape index: {}]   ;;  %s3076_s10 = inlined_call_operand.vmem [shape: f32[1,32], index: 10, kind: input, shape index: {}]   ;;  %s3077_s11 = inlined_call_operand.vmem [shape: f32[1,32], index: 11, kind: input, shape index: {}]   ;;  %s3078_s12 = inlined_call_operand.vmem [shape: f32[1,32], index: 12, kind: input, shape index: {}]   ;;  %s3079_s13 = inlined_call_operand.hbm [shape: f32[2,8,32], index: 13, kind: output, shape index: {}]  }
   0x1   :  { %3105 = sst [smem:[#allocation32_spill]] %s3067_s1 }
   0x2   :  { %3106 = sst [smem:[#allocation33_spill]] %s3069_s3 }
   0x3   :  { %3107 = sst [smem:[#allocation34_spill]] %s3073_s7 }
   0x4   :  { %3108 = sst [smem:[#allocation35_spill]] %s3075_s9 }
   0x5   :  { %3109 = sst [smem:[#allocation36_spill]] %s3076_s10 }
   0x6   :  { %3110 = sst [smem:[#allocation37_spill]] %s3077_s11 }
   0x7   :  { %3111 = sst [smem:[#allocation38_spill]] %s3078_s12 }
   0x8   :  { %3112 = sst [smem:[#allocation39_spill]] %s3079_s13 }
   0x9   :  { %18 = vsyncpa [#allocation7], 0 }
   0xa   :  { %20 = vsyncpa [#allocation7 + $0x1], 0 }
   0xb   :  { %21 = vsyncpa [#allocation10], 0 }
   0xc   :  { %23 = vsyncpa [#allocation10 + $0x1], 0 }
   0xd   :  { %24 = vsyncpa [#allocation13], 0 }
   0xe   :  { %25 = vsyncpa [#allocation16], 0 }
   0xf   :  { %26 = vsyncpa [#allocation8], 0 }
  0x10   :  { %28 = vsyncpa [#allocation8 + $0x1], 0  ;;  %s2575_s25 = smov 0   ;;  %s2577_s26 = smov 0  }
  0x11   :  { %s2579_s27 = smov 0   ;;  %s2581_s28 = smov 0  }
  0x12   :  { %s2583_s29 = smov 0   ;;  %s2585_s30 = smov 0  }
  0x13 LB: > { %3113 = sst [smem:[#allocation24_spill]] %s2464_s25  ;;  %s2606_s14 = sadd.s32 4294967295, %s2484_s30   ;;  %s2484_s30 = sphi %s2585_s30, %s34_s30   ;;  %s2480_s29 = sphi %s2583_s29, %s3162_s29   ;;  %s2476_s28 = sphi %s2581_s28, %s3161_s28   ;;  %s2472_s27 = sphi %s2579_s27, %s3165_s27   ;;  %s2468_s26 = sphi %s2577_s26, %s3164_s26   ;;  %s2464_s25 = sphi %s2575_s25, %s3163_s25  }
  0x14   : > { %3114 = sst [smem:[#allocation25_spill]] %s2476_s28  ;;  %p1855_p0 = scmp.ge.s32.totalorder %s2484_s30, 1 }
  0x15   : > { %3115 = sst [smem:[#allocation26_spill]] %s2480_s29  ;;  %p3089_p1 = scmp.eq.s32.totalorder %s2606_s14, 0 }
  0x16   : > { %3116 = sst [smem:[#allocation27_spill]] %s2484_s30  ;;  %p369_p2 = scmp.lt.s32.totalorder %s2484_s30, 3 }
  0x17   : > { %s2486_s16 = smov [#allocation12]   ;;  %s2487_s19 = smov [#allocation15]  }
  0x18   : > { %p2611_p3 = pnand %p1855_p0, %p369_p2  ;;  %s381_s17 = sshll.u32 %s2486_s16, 4  ;;  %s2615_s17 = int_to_ptr.vmem [resolvable:$true] %s381_s17 }
  0x19   : > { %s413_s20 = sshll.u32 %s2487_s19, 4  ;;  %s3119_s3 = sld [smem:[#allocation33_spill]]  ;;  %s2626_s20 = int_to_ptr.vmem [resolvable:$true] %s413_s20 }
  0x1a   : > { %s3117_s15 = scalar_select %p2611_p3, 1, 0 }
  0x1b   : > { %p2070_p4 = pneg %p2611_p3 }
  0x1d   : > { %p2622_p6 = pnand %p2070_p4, %p3089_p1 }
  0x1f   : > { %s3118_s18 = scalar_select %p2622_p6, 1, 0 }
  0x20   : > { %s2188_s23 = scalar_lea.hbm %s3119_s3, 512  ;;  %p2636_p8 = pneg %p2622_p6 }
  0x21   : > { %p2189_p7 = scmp.ne.s32.totalorder %s3119_s3, %s2188_s23  ;;  %p2195_p11 = scmp.lt.u32.totalorder %s2188_s23, %s3119_s3 }
  0x22   : > { %s3120_s13 = scalar_select %p2636_p8, 1, 0 }
  0x23   : > { %p2191_p9 = pnand %p2636_p8, %p2189_p7 }
  0x25   : > { %p2192_p10 = pneg %p2191_p9 }
  0x27   : > { %p2197_p12 = pnand %p2195_p11, %p2192_p10 }
  0x29   : > { %2200 = shalt.err (!%p2197_p12)
}
  0x2a   : > { %s2201_s21 = scalar_lea.vmem %s2615_s17, 512  ;;  %p2209_p4 = scmp.lt.s32.totalorder %s2615_s17, %s2615_s17 }
  0x2b   : > { %p2202_p13 = scmp.ne.s32.totalorder %s2615_s17, %s2201_s21  ;;  %p2210_p5 = scmp.lt.s32.totalorder %s2201_s21, %s2201_s21 }
  0x2d   : > { %p2204_p0 = pnand %p2202_p13, %p2636_p8  ;;  %p2211_p7 = por %p2210_p5, %p2209_p4 }
  0x2f   : > { %p2205_p2 = pneg %p2204_p0 }
  0x31   : > { %p2212_p9 = pnand %p2211_p7, %p2205_p2 }
  0x33   : > { %2215 = shalt.err (!%p2212_p9)
}
  0x34   : > { %s3082_s22 = smov 128   ;;  %s3083_s12 = smov 8  }
  0x35   : > { %2073 = dma.hbm_to_vmem [thread:$0]  (!%p2622_p6), %s3119_s3, 512, %s2615_s17, [#allocation13], %s3082_s22, %s3082_s22, %s3083_s12  }
  0x36   : > { %s3121_s7 = sld [smem:[#allocation34_spill]] }
  0x3c   : > { %s2216_s21 = scalar_lea.hbm %s3121_s7, 512 }
  0x3d   : > { %p2217_p5 = scmp.ne.s32.totalorder %s3121_s7, %s2216_s21  ;;  %p2223_p12 = scmp.lt.u32.totalorder %s2216_s21, %s3121_s7 }
  0x3f   : > { %p2219_p10 = pnand %p2217_p5, %p2636_p8 }
  0x41   : > { %p2220_p11 = pneg %p2219_p10 }
  0x43   : > { %p2225_p13 = pnand %p2223_p12, %p2220_p11 }
  0x45   : > { %2228 = shalt.err (!%p2225_p13)
}
  0x46   : > { %s2229_s17 = scalar_lea.vmem %s2626_s20, 512  ;;  %p2237_p7 = scmp.lt.s32.totalorder %s2626_s20, %s2626_s20 }
  0x47   : > { %p2230_p0 = scmp.ne.s32.totalorder %s2626_s20, %s2229_s17  ;;  %p2238_p9 = scmp.lt.s32.totalorder %s2229_s17, %s2229_s17 }
  0x49   : > { %p2232_p2 = pnand %p2230_p0, %p2636_p8  ;;  %p2239_p5 = por %p2238_p9, %p2237_p7 }
  0x4b   : > { %p2233_p4 = pneg %p2232_p2 }
  0x4d   : > { %p2240_p10 = pnand %p2239_p5, %p2233_p4 }
  0x4f   : > { %2243 = shalt.err (!%p2240_p10)
}
  0x50   : > { %2079 = dma.hbm_to_vmem [thread:$0]  (!%p2622_p6), %s3121_s7, 512, %s2626_s20, [#allocation16], %s3082_s22, %s3082_s22, %s3083_s12  }
  0x51   : > { %s1854_s11 = sadd.s32 4294967294, %s2484_s30   ;;  %s46_s28 = sadd.s32 1, %s2480_s29 }
  0x52   : > { %p48_p11 = scmp.ge.s32.totalorder %s46_s28, 2  ;;  %s55_s23 = sadd.s32 1, %s2472_s27 }
  0x53   : > { %p62_p12 = scmp.ne.s32.totalorder %s2472_s27, %s2468_s26  ;;  %p63_p13 = scmp.eq.s32.totalorder %s2484_s30, 0 }
  0x54   : > { %s3167_s28 = smov (%p48_p11, %s46_s28), 0  ;;  %p68_p2 = scmp.ne.s32.totalorder %s2468_s26, %s2464_s25 }
  0x55   : > { %3122 = sst [smem:[#allocation28_spill]] %s3167_s28  ;;  %p2694_p0 = por %p63_p13, %p62_p12 }
  0x56   : > { %s50_s20 = ssub.s32 %s2480_s29, %s3167_s28  ;;  %p356_p4 = scmp.eq.s32.totalorder %s2606_s14, 1 }
  0x57   : > { %p53_p7 = scmp.eq.s32.totalorder %s50_s20, 0  ;;  %p2705_p9 = por %p3089_p1, %p68_p2 }
  0x58   : > { %p2709_p5 = por %p356_p4, %p62_p12  ;;  %p362_p10 = scmp.eq.s32.totalorder %s1854_s11, 1 }
  0x59   : > { %s3124_s16 = scalar_select %p2705_p9, 1, 0 }
  0x5a   : > { %s3125_s19 = scalar_select %p2709_p5, 1, 0 }
  0x5b   : > { %s2714_s21 = scalar_select %p53_p7, %s2472_s27, %s55_s23  }
  0x5c   : > { %3126 = sst [smem:[#allocation29_spill]] %s3125_s19  ;;  %p2716_p11 = por %p362_p10, %p68_p2 }
  0x5d   : > { %3127 = sst [smem:[#allocation30_spill]] %s2714_s21  ;;  %p2101_p13 = scmp.lt.s32.totalorder %s2484_s30, 2 }
  0x5e   : > { %s3128_s17 = scalar_select %p2716_p11, 1, 0 }
  0x5f   : > { %s3084_s9 = sand.u32 1, %s2472_s27   ;;  %s2723_s10 = sshll.u32 %s2480_s29, 7 }
  0x60   : > { %3129 = sst [smem:[#allocation31_spill]] %s3128_s17  ;;  %s2727_s20 = sshll.u32 %s3084_s9, 3 }
  0x61   : > { %p2731_p12 = pnand %p2101_p13, %p2694_p0  ;;  %s469_s11 = sand.u32 1, %s2484_s30  }
  0x62   : > { %s3131_s1 = sld [smem:[#allocation32_spill]]  ;;  %s473_s7 = scalar_lea.vmem [#allocation9], %s2727_s20 }
  0x63   : > { %s3130_s22 = scalar_select %p2731_p12, 1, 0 }
  0x64   : > { %s480_s9 = sshll.u32 %s473_s7, 4  ;;  %s2745_s24 = scalar_lea.sflag [#allocation10], %s469_s11  ;;  %s2743_s9 = int_to_ptr.vmem [resolvable:$true] %s480_s9 }
  0x65   : > { %p2751_p2 = pneg %p2731_p12 }
  0x67   : > { %s3132_s29 = scalar_select %p2751_p2, 1, 0 }
  0x68   : > { %s2740_s3 = scalar_lea.hbm %s3131_s1, %s2723_s10  ;;  %s2249_s21 = scalar_lea.hbm %s3131_s1, 256 }
  0x69   : > { %s2244_s28 = scalar_lea.hbm %s2740_s3, 128  ;;  %p2250_p10 = scmp.lt.u32.totalorder %s2740_s3, %s3131_s1 }
  0x6a   : > { %p2245_p0 = scmp.ne.s32.totalorder %s2740_s3, %s2244_s28  ;;  %p2251_p13 = scmp.lt.u32.totalorder %s2249_s21, %s2244_s28 }
  0x6b   : > { %p2253_p11 = scmp.lt.u32.totalorder %s2244_s28, %s2740_s3 }
  0x6c   : > { %p2247_p4 = pnand %p2751_p2, %p2245_p0  ;;  %p2252_p1 = por %p2251_p13, %p2250_p10 }
  0x6e   : > { %p2248_p7 = pneg %p2247_p4  ;;  %p2254_p5 = por %p2253_p11, %p2252_p1 }
  0x70   : > { %p2255_p9 = pnand %p2254_p5, %p2248_p7 }
  0x72   : > { %2258 = shalt.err (!%p2255_p9)
}
  0x73   : > { %s2259_s11 = scalar_lea.vmem %s2743_s9, 128  ;;  %s2490_s12 = smov [#allocation9]  }
  0x74   : > { %p2260_p0 = scmp.ne.s32.totalorder %s2743_s9, %s2259_s11  ;;  %s2264_s23 = sshll.u32 %s2490_s12, 4  ;;  %s2265_s23 = int_to_ptr.vmem [resolvable:$false] %s2264_s23 }
  0x75   : > { %s2266_s30 = scalar_lea.vmem %s2265_s23, 256  ;;  %p2267_p6 = scmp.lt.s32.totalorder %s2743_s9, %s2265_s23 }
  0x76   : > { %p2262_p4 = pnand %p2260_p0, %p2751_p2  ;;  %p2268_p8 = scmp.lt.s32.totalorder %s2266_s30, %s2259_s11 }
  0x78   : > { %p2263_p3 = pneg %p2262_p4  ;;  %p2269_p10 = por %p2268_p8, %p2267_p6 }
  0x7a   : > { %p2270_p13 = pnand %p2269_p10, %p2263_p3 }
  0x7c   : > { %2273 = shalt.err (!%p2270_p13)
}
  0x7d   : > { %2089 = dma.hbm_to_vmem [thread:$0]  (!%p2731_p12), %s2740_s3, 128, %s2743_s9, %s2745_s24  }
  0x7e   : > { %s2491_s28 = smov [#allocation14]   ;;  %s2492_s7 = smov [#allocation17]  }
  0x7f   : > { %s397_s21 = sshll.u32 %s2491_s28, 4  ;;  %s427_s1 = sshll.u32 %s2492_s7, 4  ;;  %s398_s21 = int_to_ptr.vmem [resolvable:$true] %s397_s21  ;;  %s428_s1 = int_to_ptr.vmem [resolvable:$true] %s427_s1 }
  0x80   : > { %s2274_s23 = scalar_lea.hbm %s3071_s5, 512  ;;  %p3133_p3 = scmp.ne.s32.totalorder %s3120_s13, 0 }
  0x81   : > { %p2275_p1 = scmp.ne.s32.totalorder %s3071_s5, %s2274_s23  ;;  %p2281_p9 = scmp.lt.u32.totalorder %s2274_s23, %s3071_s5 }
  0x83   : > { %p2277_p6 = pnand %p2275_p1, %p3133_p3 }
  0x85   : > { %p2278_p8 = pneg %p2277_p6 }
  0x87   : > { %p2283_p5 = pnand %p2281_p9, %p2278_p8 }
  0x89   : > { %2286 = shalt.err (!%p2283_p5)
}
  0x8a   : > { %s2287_s3 = scalar_lea.vmem %s398_s21, 512  ;;  %p2295_p4 = scmp.lt.s32.totalorder %s398_s21, %s398_s21 }
  0x8b   : > { %p2288_p11 = scmp.ne.s32.totalorder %s398_s21, %s2287_s3  ;;  %p2296_p10 = scmp.lt.s32.totalorder %s2287_s3, %s2287_s3 }
  0x8d   : > { %p2290_p7 = pnand %p2288_p11, %p3133_p3  ;;  %p2297_p13 = por %p2296_p10, %p2295_p4 }
  0x8f   : > { %p2291_p0 = pneg %p2290_p7 }
  0x91   : > { %p2298_p12 = pnand %p2297_p13, %p2291_p0 }
  0x93   : > { %2301 = shalt.err (!%p2298_p12)
}
  0x94   : > { %p3134_p1 = scmp.ne.s32.totalorder %s3118_s18, 0  ;;  %s3135_s17 = smov 8  }
  0x95   : > { %s3136_s9 = smov 128   ;;  %s2302_s12 = scalar_lea.hbm %s3074_s8, 16 }
  0x96   : > { %2076 = dma.hbm_to_vmem [thread:$0]  (!%p3134_p1), %s3071_s5, 512, %s398_s21, [#allocation13], %s3136_s9, %s3136_s9, %s3135_s17  }
  0x97   : > { %p2303_p6 = scmp.ne.s32.totalorder %s3074_s8, %s2302_s12  ;;  %p2309_p9 = scmp.lt.u32.totalorder %s2302_s12, %s3074_s8 }
  0x99   : > { %p2305_p12 = pnand %p2303_p6, %p3133_p3 }
  0x9b   : > { %p2306_p8 = pneg %p2305_p12 }
  0x9d   : > { %p2311_p5 = pnand %p2309_p9, %p2306_p8 }
  0x9f   : > { %2314 = shalt.err (!%p2311_p5)
}
  0xa0   : > { %s2315_s25 = scalar_lea.vmem %s428_s1, 16  ;;  %s2322_s21 = scalar_lea.vmem %s428_s1, 32 }
  0xa1   : > { %p2316_p11 = scmp.ne.s32.totalorder %s428_s1, %s2315_s25  ;;  %p2323_p4 = scmp.lt.s32.totalorder %s428_s1, %s428_s1 }
  0xa2   : > { %p2324_p10 = scmp.lt.s32.totalorder %s2322_s21, %s2315_s25 }
  0xa3   : > { %p2318_p7 = pnand %p2316_p11, %p3133_p3 }
  0xa4   : > { %p2325_p13 = por %p2324_p10, %p2323_p4 }
  0xa5   : > { %p2319_p0 = pneg %p2318_p7 }
  0xa7   : > { %p2326_p2 = pnand %p2325_p13, %p2319_p0 }
  0xa9   : > { %2329 = shalt.err (!%p2326_p2)
}
  0xaa   : > { %2082 = dma.hbm_to_vmem [thread:$0]  (!%p3134_p1), %s3074_s8, 16, %s428_s1, [#allocation16]  }
  0xab   : > { %s2818_s28 = scalar_lea.hbm %s3066_s0, %s2723_s10  ;;  %s454_s7 = scalar_lea.vmem [#allocation6], %s2727_s20 }
  0xac   : > { %s462_s18 = sshll.u32 %s454_s7, 4  ;;  %s2827_s11 = scalar_lea.hbm %s3068_s2, %s2723_s10  ;;  %s2821_s18 = int_to_ptr.vmem [resolvable:$true] %s462_s18 }
  0xad   : > { %s3137_s30 = sand.u32 1, %s2472_s27   ;;  %s2330_s3 = scalar_lea.hbm %s2818_s28, 128 }
  0xae   : > { %s451_s1 = scalar_lea.sflag [#allocation7], %s3137_s30  ;;  %p2331_p2 = scmp.ne.s32.totalorder %s2818_s28, %s2330_s3 }
  0xaf   : > { %p3138_p3 = scmp.ne.s32.totalorder %s3132_s29, 0  ;;  %s2335_s17 = scalar_lea.hbm %s3066_s0, 256 }
  0xb0   : > { %p2336_p12 = scmp.lt.u32.totalorder %s2818_s28, %s3066_s0  ;;  %p2337_p8 = scmp.lt.u32.totalorder %s2335_s17, %s2330_s3 }
  0xb1   : > { %p2333_p1 = pnand %p2331_p2, %p3138_p3  ;;  %p2339_p5 = scmp.lt.u32.totalorder %s2330_s3, %s2818_s28 }
  0xb2   : > { %p2338_p9 = por %p2337_p8, %p2336_p12 }
  0xb3   : > { %p2334_p6 = pneg %p2333_p1 }
  0xb4   : > { %p2340_p11 = por %p2339_p5, %p2338_p9 }
  0xb6   : > { %p2341_p7 = pnand %p2340_p11, %p2334_p6 }
  0xb8   : > { %2344 = shalt.err (!%p2341_p7)
}
  0xb9   : > { %s2345_s10 = scalar_lea.vmem %s2821_s18, 128  ;;  %s2493_s19 = smov [#allocation6]  }
  0xba   : > { %p2346_p0 = scmp.ne.s32.totalorder %s2821_s18, %s2345_s10  ;;  %s2350_s7 = sshll.u32 %s2493_s19, 4  ;;  %s2351_s7 = int_to_ptr.vmem [resolvable:$false] %s2350_s7 }
  0xbb   : > { %s2352_s12 = scalar_lea.vmem %s2351_s7, 256  ;;  %p2353_p13 = scmp.lt.s32.totalorder %s2821_s18, %s2351_s7 }
  0xbc   : > { %p2348_p4 = pnand %p2346_p0, %p3138_p3  ;;  %p2354_p2 = scmp.lt.s32.totalorder %s2352_s12, %s2345_s10 }
  0xbe   : > { %p2349_p10 = pneg %p2348_p4  ;;  %p2355_p1 = por %p2354_p2, %p2353_p13 }
  0xc0   : > { %p2356_p12 = pnand %p2355_p1, %p2349_p10 }
  0xc2   : > { %2359 = shalt.err (!%p2356_p12)
}
  0xc3   : > { %p3139_p6 = scmp.ne.s32.totalorder %s3130_s22, 0  ;;  %s491_s23 = scalar_lea.vmem [#allocation11], %s2727_s20 }
  0xc4   : > { %s498_s30 = sshll.u32 %s491_s23, 4  ;;  %s2360_s3 = scalar_lea.hbm %s2827_s11, 128  ;;  %s499_s30 = int_to_ptr.vmem [resolvable:$true] %s498_s30 }
  0xc5   : > { %2086 = dma.hbm_to_vmem [thread:$0]  (!%p3139_p6), %s2818_s28, 128, %s2821_s18, %s451_s1  }
  0xc6   : > { %p2361_p8 = scmp.ne.s32.totalorder %s2827_s11, %s2360_s3  ;;  %s2365_s17 = scalar_lea.hbm %s3068_s2, 256 }
  0xc7   : > { %p2366_p11 = scmp.lt.u32.totalorder %s2827_s11, %s3068_s2  ;;  %p2367_p7 = scmp.lt.u32.totalorder %s2365_s17, %s2360_s3 }
  0xc8   : > { %p2363_p9 = pnand %p2361_p8, %p3138_p3  ;;  %p2369_p4 = scmp.lt.u32.totalorder %s2360_s3, %s2827_s11 }
  0xc9   : > { %p2368_p0 = por %p2367_p7, %p2366_p11 }
  0xca   : > { %p2364_p5 = pneg %p2363_p9 }
  0xcb   : > { %p2370_p10 = por %p2369_p4, %p2368_p0 }
  0xcd   : > { %p2371_p13 = pnand %p2370_p10, %p2364_p5 }
  0xcf   : > { %2374 = shalt.err (!%p2371_p13)
}
  0xd0   : > { %s2375_s20 = scalar_lea.vmem %s499_s30, 128  ;;  %s2494_s28 = smov [#allocation11]  }
  0xd1   : > { %p2376_p2 = scmp.ne.s32.totalorder %s499_s30, %s2375_s20  ;;  %s2380_s18 = sshll.u32 %s2494_s28, 4  ;;  %s2381_s18 = int_to_ptr.vmem [resolvable:$false] %s2380_s18 }
  0xd2   : > { %s2382_s1 = scalar_lea.vmem %s2381_s18, 256  ;;  %p2383_p8 = scmp.lt.s32.totalorder %s499_s30, %s2381_s18 }
  0xd3   : > { %p2378_p1 = pnand %p2376_p2, %p3138_p3  ;;  %p2384_p9 = scmp.lt.s32.totalorder %s2382_s1, %s2375_s20 }
  0xd5   : > { %p2379_p12 = pneg %p2378_p1  ;;  %p2385_p6 = por %p2384_p9, %p2383_p8 }
  0xd7   : > { %p2386_p7 = pnand %p2385_p6, %p2379_p12 }
  0xd9   : > { %2389 = shalt.err (!%p2386_p7)
}
  0xda   : > { %p3140_p11 = scmp.ne.s32.totalorder %s3130_s22, 0  ;;  %p3141_p5 = scmp.ne.s32.totalorder %s3117_s15, 0 }
  0xdb   : > { %s2874_s29 = sand.u32 (!%p3141_p5), 1, %s2468_s26   ;;  %p3142_p3 = scmp.ne.s32.totalorder (!%p3141_p5), %s3124_s16, 0 }
  0xdc   : > { %2092 = dma.hbm_to_vmem [thread:$0]  (!%p3140_p11), %s2827_s11, 128, %s499_s30, %s2745_s24  }
  0xdd   : > { %507 = sbr.rel (%p3141_p5) target bundleno = 2112 (0x840), region = 72  ;;  %s2877_s10 = sshll.u32 (!%p3141_p5), %s2874_s29, 3 }
  0xde   : > { %s510_s19 = scalar_lea.sflag (!%p3141_p5), [#allocation7], %s2874_s29  ;;  %s513_s7 = scalar_lea.vmem (!%p3141_p5), [#allocation6], %s2877_s10 }
  0xe4   : > { %2443 = dma.done.wait (%p3142_p3), %s510_s19, 128  }
  0xe5   : > { %2445 = vsyncadd (%p3142_p3), %s510_s19, 4294967168  ;;  %s518_s15 = sand.u32 1, %s2606_s14   ;;  %s522_s24 = scalar_lea.vmem [#allocation9], %s2877_s10 }
  0xe6   : > { %s519_s22 = scalar_lea.sflag [#allocation10], %s518_s15 }
  0xe7   : > { %2447 = dma.done.wait (%p3142_p3), %s519_s22, 256  }
  0xe8   : > { %2449 = vsyncadd (%p3142_p3), %s519_s22, 4294967040  ;;  %s531_s11 = scalar_lea.vmem [#allocation11], %s2877_s10  ;;  %p3143_p6 = scmp.eq.s32.totalorder %s2606_s14, 0 }
  0xea   : > { %2451 = dma.done.wait (%p3143_p6), [#allocation13], 1024   ;;  %p3144_p0 = pmov %p3143_p6 }
  0xec   : > { %2453 = vsyncadd (%p3144_p0), [#allocation13], 4294966272  ;;  %p3145_p4 = pmov %p3144_p0 }
  0xed   : > { %p3146_p10 = pmov %p3144_p0 }
  0xee   : > { %2455 = dma.done.wait (%p3145_p4), [#allocation16], 528  }
  0xef   : > { %2457 = vsyncadd (%p3146_p10), [#allocation16], 4294966768  ;;  %v2495_v0 = vmov 0.0|0.0   ;;  %vm2496_vm0 = vmmov 0   ;;  %v2497_v1 = vmov 0.0   ;;  %v605_v2 = vld [vmem:[#allocation14] sm:$0xff] }
  0xf0   : > { %2022 = vmatprep.subr.bf16.mxu0 %v2495_v0  ;;  %1946 = vmatprep.mubr.msk.f32.mxu0 %vm2496_vm0, %v2497_v1  ;;  %v606_v3 = vld [vmem:[#allocation14 + $0x8] sm:$0xff]  ;;  %v607_v4 = vld [vmem:[#allocation14 + $0x10] sm:$0xff]  ;;  %v608_v6 = vld [vmem:[#allocation14 + $0x18] sm:$0xff]  ;;  %vm616_vm1 = vcmask 261120   ;;  %vm867_vm2 = vcmask 64512   ;;  %s2498_s30 = smov 120  }
  0xf1   : > { %2028 = vmatprep.subr.bf16.mxu1 %v2495_v0  ;;  %1957 = vmatprep.mubr.msk.f32.mxu1 %vm2496_vm0, %v2497_v1  ;;  %v2023_v5 = vpack.c.bf16 %v606_v3, %v605_v2  ;;  %v2026_v7 = vpack.c.bf16 %v608_v6, %v607_v4  ;;  %v691_v8 = vld [vmem:[#allocation15] sm:$0xff]  ;;  %v692_v9 = vld [vmem:[#allocation15 + $0x8] sm:$0xff]  ;;  %v780_v15 = vld [vmem:[#allocation12 + $0x10] sm:$0xff]  ;;  %s2499_s3 = smov 112   ;;  %s2500_s25 = smov 104   ;;  %vm1204_vm3 = vcmask 130112  }
  0xf2   : > { %v778_v10 = vld [vmem:[#allocation12] sm:$0xff]  ;;  %v779_v11 = vld [vmem:[#allocation12 + $0x8] sm:$0xff]  ;;  %v2029_v12 = vpack.c.bf16 %v692_v9, %v691_v8  ;;  %v781_v16 = vld [vmem:[#allocation12 + $0x18] sm:$0xff]  ;;  %s3147_s9 = sld [smem:[#allocation35_spill]]  ;;  %s2502_s15 = smov 16   ;;  %vm1381_vm4 = vcmask 195712  }
  0xf3   : > { %2024 = vmatpush3.bf16.msra.mxu0 %v2023_v5  ;;  %v604_v13 = vld [vmem:[%s522_s24] sm:$0xff]  ;;  %v2035_v14 = vpack.c.bf16 %v779_v11, %v778_v10  ;;  %v2038_v17 = vpack.c.bf16 %v781_v16, %v780_v15  ;;  %v2915_v18 = vld [vmem:[%s513_s7] sm:$0xff]  ;;  %s2501_s7 = smov 8   ;;  %s2503_s22 = smov 24   ;;  %vm1558_vm5 = vcmask 261312  }
  0xf4   : > { %2025 = vmatprep.subr.bf16.mxu0 %v2495_v0  ;;  %2030 = vmatpush3.bf16.msra.mxu1 %v2029_v12  ;;  %v693_v19 = vld [vmem:[#allocation15 + $0x10] sm:$0xff]  ;;  %v694_v20 = vld [vmem:[#allocation15 + $0x18] sm:$0xff]  ;;  %v1878_v33 = vld [vmem:[#allocation17] ss:$0 sm:$0xff]  ;;  %s3148_s14 = sld [smem:[#allocation36_spill]]  ;;  %s3150_s12 = sld [smem:[#allocation29_spill]] }
  0xf5   : > { %2031 = vmatprep.subr.bf16.mxu1 %v2495_v0  ;;  %v2032_v21 = vpack.c.bf16 %v694_v20, %v693_v19  ;;  %v690_v22 = vld [vmem:[%s531_s11] sm:$0xff]  ;;  %s3149_s16 = sld [smem:[#allocation25_spill]]  ;;  %s3152_s17 = sld [smem:[#allocation38_spill]] }
  0xf6   : > { %v1876_v23 = vld [vmem:[%s3072_s6] ss:$0 sm:$0xff]  ;;  %s599_s20 = scalar_lea.vmem [#allocation18], %s2877_s10  ;;  %s3153_s19 = sld [smem:[#allocation39_spill]] }
  0xf7   : > { %2027 = vmatpush3.bf16.msra.mxu0 %v2026_v7  ;;  %v1880_v27 = vld [vmem:[%s3070_s4] ss:$0 sm:$0xff]  ;;  %s1692_s28 = sshll.u32 %s599_s20, 4  ;;  %s2504_s10 = smov [#allocation18]   ;;  %s3018_s28 = int_to_ptr.vmem [resolvable:$true] %s1692_s28 }
  0xf8   : > { %2034 = vmatprep.subr.bf16.mxu0 %v2495_v0  ;;  %2033 = vmatpush3.bf16.msra.mxu1 %v2032_v21  ;;  %s2394_s24 = sshll.u32 %s2504_s10, 4  ;;  %s2395_s24 = int_to_ptr.vmem [resolvable:$false] %s2394_s24 }
  0xf9   : > { %1971 = vmatprep.subr.mxu1 %v2497_v1  ;;  %s2396_s11 = scalar_lea.vmem %s2395_s24, 256  ;;  %p2397_p8 = scmp.lt.s32.totalorder %s3018_s28, %s2395_s24 }
  0xfa   : > { %1947 = vmatmul.mubr.msk.f32.vlgmr.msra.gmra.mrb[0].mxu0 %vm616_vm1, %v604_v13  ;;  %p3154_p2 = scmp.ne.s32.totalorder %s3150_s12, 0 }
  0xfb   : > { %2036 = vmatpush3.bf16.msra.mxu0 %v2035_v14  ;;  %1968 = vmatprep.mubr.msk.f32.mxu0 %vm2496_vm0, %v2497_v1  ;;  %s1899_s13 = sshll.u32 %s3149_s16, 7 }
  0xfc   : > { %2037 = vmatprep.subr.bf16.mxu0 %v2495_v0  ;;  %1958 = vmatmul.mubr.msk.f32.vlgmr.msra.gmra.mrb[0].mxu1 %vm616_vm1, %v690_v22 }
  0xfd   : > { %1973 = vmatprep.mubr.msk.f32.mxu1 %vm2496_vm0, %v2497_v1 }
  0xff   : > { %2039 = vmatpush3.bf16.msra.mxu0 %v2038_v17 }
 0x100   : > { %1991 = vmatprep.subr.mxu0 %v2497_v1 }
 0x102   : > { %1969 = vmatmul.mubr.msk.f32.vlgmr.msra.gmra.mrb[2].mxu0 %vm616_vm1, %v2915_v18 }
 0x103   : > { %1993 = vmatprep.mubr.msk.f32.mxu0 %vm2496_vm0, %v2497_v1 }
 0x1cd   : > { %v686_v24 = vpop.f32.mrb[0].mxu0 }
 0x1ce   : > { %v687_v25 = vadd.f32 %v1876_v23, %v686_v24  ;;  %v1948_v26 = vpop.f32.mrb[1].mxu0 }
 0x1cf   : > { %v771_v34 = vpop.f32.mrb[0].mxu1  ;;  %v1562_v26 = vld [vmem:[%s3147_s9 + $0x8] sm:$0xff] }
 0x1d0   : > { %775 = vst.msk [vmem:[#allocation2] sm:$0xff] %vm616_vm1, %v687_v25  ;;  %v772_v35 = vadd.f32 %v1878_v33, %v771_v34  ;;  %v1959_v36 = vpop.f32.mrb[1].mxu1 }
 0x1d2   : > { %776 = vst.msk [vmem:[#allocation3] sm:$0xff] %vm616_vm1, %v772_v35 }
 0x1d5   : > { %v859_v28 = vpop.f32.mrb[2].mxu0 }
 0x1d6   : > { %v860_v29 = vadd.f32 %v1880_v27, %v859_v28  ;;  %v1970_v30 = vpop.f32.mrb[3].mxu0  ;;  %v1563_v28 = vld [vmem:[%s3147_s9 + $0x10] sm:$0xff] }
 0x1d7   : > { %v865_v31 = vld [vmem:[#allocation2] sm:$0xff] }
 0x1d8   : > { %863 = vst.msk [vmem:[#allocation4] sm:$0xff] %vm616_vm1, %v860_v29  ;;  %1972 = vmatpush3.xpose.msk.msra.mxu1 %vm867_vm2, %v865_v31  ;;  %v1564_v29 = vld [vmem:[%s3147_s9 + $0x18] sm:$0xff] }
 0x1d9   : > { %1976 = vmatprep.subr.mxu1 %v2497_v1  ;;  %v1208_v37 = vld [vmem:[#allocation3] sm:$0xff] }
 0x1df   : > { %v1029_v32 = vld [vmem:[#allocation4] sm:$0xff] }
 0x1e0   : > { %1033 = vrot.lane.b32.xlu1 %v1029_v32, %s2498_s30  ;;  %1974 = vmatmul.mubr.msk.f32.vlgmr.msra.gmra.mrb[2].mxu1 %vm867_vm2, %v1029_v32 }
 0x1e1   : > { %1978 = vmatprep.mubr.msk.f32.mxu1 %vm2496_vm0, %v2497_v1  ;;  %1977 = vmatpush3.msra.mxu1 %v1208_v37 }
 0x1e2   : > { %1981 = vmatprep.subr.mxu1 %v2497_v1 }
 0x1e4   : > { %1213 = vrot.lane.b32.xlu1 %v865_v31, %s2499_s3 }
 0x1e8   : > { %1210 = vrot.lane.b32.xlu1 %v1029_v32, %s2499_s3 }
 0x1ec   : > { %1390 = vrot.lane.b32.xlu1 %v865_v31, %s2500_s25 }
 0x1f0   : > { %1387 = vrot.lane.b32.xlu1 %v1029_v32, %s2500_s25  ;;  %v2044_v32 = vpack.c.bf16 %v1564_v29, %v1563_v28 }
 0x1f4   : > { %1299 = vrot.lane.b32.xlu1 %v1208_v37, %s2499_s3  ;;  %s3151_s3 = sld [smem:[#allocation37_spill]] }
 0x252   : > { %v1034_v38 = vpop.permute.xlu1 %1033 }
 0x256   : > { %v1214_v39 = vpop.permute.xlu1 %1213 }
 0x257   : > { %1992 = vmatpush3.xpose.msk.msra.mxu0 %vm867_vm2, %v1214_v39 }
 0x258   : > { %2001 = vmatprep.subr.mxu0 %v2497_v1 }
 0x25a   : > { %v1211_v40 = vpop.permute.xlu1 %1210 }
 0x25b   : > { %1994 = vmatmul.mubr.msk.f32.vlgmr.msra.gmra.mrb[4].mxu0 %vm867_vm2, %v1211_v40 }
 0x25c   : > { %2003 = vmatprep.mubr.msk.f32.mxu0 %vm2496_vm0, %v2497_v1 }
 0x25e   : > { %v1391_v41 = vpop.permute.xlu1 %1390 }
 0x25f   : > { %2002 = vmatpush3.xpose.msk.msra.mxu0 %vm867_vm2, %v1391_v41 }
 0x260   : > { %2040 = vmatprep.subr.bf16.mxu0 %v2495_v0 }
 0x262   : > { %v1388_v42 = vpop.permute.xlu1 %1387 }
 0x263   : > { %2004 = vmatmul.mubr.msk.f32.vlgmr.msra.gmra.mrb[6].mxu0 %vm867_vm2, %v1388_v42 }
 0x264   : > { %2019 = vmatprep.mubr.msk.f32.mxu0 %vm2496_vm0, %v2497_v1 }
 0x266   : > { %v1300_v6 = vpop.permute.xlu1 %1299 }
 0x2b3   : > { %v940_v43 = vpop.f32.mrb[2].mxu1 }
 0x2b4   : > { %v1975_v44 = vpop.f32.mrb[3].mxu1  ;;  %v944_v45 = vsel %vm867_vm2, %v940_v43, -inf }
 0x2b5   : > { %945 = vmax.xlane.f32.xlu0 %v944_v45 }
 0x2cb   : > { %1036 = vrot.lane.b32.xlu0 %v865_v31, %s2498_s30 }
 0x32e   : > { %v1285_v46 = vpop.f32.mrb[4].mxu0 }
 0x32f   : > { %v1995_v47 = vpop.f32.mrb[5].mxu0  ;;  %v1289_v48 = vsel %vm867_vm2, %v1285_v46, -inf }
 0x330   : > { %1290 = vmax.xlane.f32.xlu0 %v1289_v48 }
 0x336   : > { %v1462_v49 = vpop.f32.mrb[6].mxu0 }
 0x337   : > { %v2005_v50 = vpop.f32.mrb[7].mxu0  ;;  %v1466_v51 = vsel %vm867_vm2, %v1462_v49, -inf }
 0x338   : > { %1467 = vmax.xlane.f32.xlu1 %v1466_v51 }
 0x342   : > { %v946_v52 = vpop.xlane.xlu0 %945 }
 0x343   : > { %v947_v53 = vsub.f32 %v940_v43, %v946_v52 }
 0x345   : > { %v948_v54 = vmul.f32 1.442695, %v947_v53 }
 0x346   : > { %1122 = vrot.lane.b32.xlu0 %v1208_v37, %s2498_s30  ;;  %v1037_v56 = vpop.permute.xlu0 %1036 }
 0x347   : > { %2170 = vpow2.f32 %v948_v54 }
 0x351   : > { %v2171_v55 = vpop.eup %2170 }
 0x352   : > { %1979 = vmatmul.mubr.msk.f32.vlgmr.msra.gmra.mrb[4].mxu1 %vm867_vm2, %v2171_v55  ;;  %v950_v19 = vsel %vm867_vm2, %v2171_v55, 0.0 }
 0x353   : > { %1982 = vmatpush3.xpose.msk.msra.mxu1 %vm867_vm2, %v1037_v56  ;;  %1983 = vmatprep.mubr.msk.f32.mxu1 %vm2496_vm0, %v2497_v1 }
 0x354   : > { %1986 = vmatprep.subr.mxu1 %v2497_v1 }
 0x356   : > { %1984 = vmatmul.mubr.msk.f32.vlgmr.msra.gmra.mrb[6].mxu1 %vm867_vm2, %v1034_v38 }
 0x357   : > { %1988 = vmatprep.mubr.msk.f32.mxu1 %vm2496_vm0, %v2497_v1 }
 0x3bd   : > { %v1291_v57 = vpop.xlane.xlu0 %1290 }
 0x3be   : > { %v1292_v58 = vsub.f32 %v1285_v46, %v1291_v57  ;;  %v1894_v46 = vld [vmem:[%s3148_s14] ss:$0 sm:$0xff] }
 0x3c0   : > { %v1293_v3 = vmul.f32 1.442695, %v1292_v58 }
 0x3c1   : > { %v1123_v59 = vpop.permute.xlu0 %1122 }
 0x3c2   : > { %1987 = vmatpush3.msra.mxu1 %v1123_v59  ;;  %2172 = vpow2.f32 %v1293_v3 }
 0x3c3   : > { %1996 = vmatprep.subr.mxu1 %v2497_v1 }
 0x3c5   : > { %v1468_v7 = vpop.xlane.xlu1 %1467 }
 0x3c6   : > { %v1469_v8 = vsub.f32 %v1462_v49, %v1468_v7 }
 0x3c8   : > { %v1470_v11 = vmul.f32 1.442695, %v1469_v8 }
 0x3cc   : > { %v2173_v4 = vpop.eup %2172 }
 0x3cd   : > { %v1295_v5 = vsel %vm867_vm2, %v2173_v4, 0.0 }
 0x425   : > { %v1022_v60 = vpop.f32.mrb[4].mxu1 }
 0x426   : > { %v1980_v61 = vpop.f32.mrb[5].mxu1 }
 0x429   : > { %v1108_v62 = vpop.f32.mrb[6].mxu1 }
 0x42a   : > { %v1985_v63 = vpop.f32.mrb[7].mxu1  ;;  %v1112_v2 = vsel %vm867_vm2, %v1108_v62, -inf }
 0x42b   : > { %1113 = vmax.xlane.f32.xlu1 %v1112_v2 }
 0x43c   : > { %1476 = vrot.lane.b32.xlu1 %v1208_v37, %s2500_s25 }
 0x460   : > { %1296 = vadd.xlane.f32.xlu1 %v1295_v5 }
 0x4b8   : > { %v1114_v9 = vpop.xlane.xlu1 %1113 }
 0x4b9   : > { %v1115_v10 = vsub.f32 %v1108_v62, %v1114_v9  ;;  %v1897_v62 = vld [vmem:[%s3152_s17] ss:$0 sm:$0xff] }
 0x4bb   : > { %v1116_v12 = vmul.f32 1.442695, %v1115_v10 }
 0x4bc   : > { %v1477_v16 = vpop.permute.xlu1 %1476 }
 0x4bd   : > { %2174 = vpow2.f32 %v1116_v12 }
 0x4be   : > { %2176 = vpow2.f32 %v1470_v11 }
 0x4c7   : > { %v2175_v13 = vpop.eup %2174 }
 0x4c8   : > { %1989 = vmatmul.mubr.msk.f32.vlgmr.msra.gmra.mrb[8].mxu1 %vm867_vm2, %v2175_v13  ;;  %v1118_v14 = vsel %vm867_vm2, %v2175_v13, 0.0  ;;  %v2177_v15 = vpop.eup %2176 }
 0x4c9   : > { %1997 = vmatpush3.msra.mxu1 %v1300_v6  ;;  %1119 = vadd.xlane.f32.xlu0 %v1118_v14  ;;  %v1472_v17 = vsel %vm867_vm2, %v2177_v15, 0.0 }
 0x4ca   : > { %1998 = vmatprep.mubr.msk.f32.mxu1 %vm2496_vm0, %v2497_v1  ;;  %2006 = vmatprep.subr.mxu1 %v2497_v1 }
 0x4cc   : > { %1999 = vmatmul.mubr.msk.f32.vlgmr.msra.gmra.mrb[10].mxu1 %vm867_vm2, %v2173_v4 }
 0x4cd   : > { %2007 = vmatpush3.msra.mxu1 %v1477_v16  ;;  %1473 = vadd.xlane.f32.xlu0 %v1472_v17 }
 0x4ce   : > { %2008 = vmatprep.mubr.msk.f32.mxu1 %vm2496_vm0, %v2497_v1  ;;  %v1561_v1 = vld [vmem:[%s3147_s9] sm:$0xff] }
 0x4cf   : > { %v2041_v27 = vpack.c.bf16 %v1562_v26, %v1561_v1 }
 0x4d0   : > { %2009 = vmatmul.mubr.msk.f32.vlgmr.msra.gmra.mrb[12].mxu1 %vm867_vm2, %v2177_v15 }
 0x4d1   : > { %951 = vadd.xlane.f32.xlu0 %v950_v19  ;;  %2042 = vmatpush3.bf16.msra.mxu0 %v2041_v27 }
 0x4d2   : > { %2043 = vmatprep.subr.bf16.mxu0 %v2495_v0 }
 0x4d5   : > { %2045 = vmatpush3.bf16.msra.mxu0 %v2044_v32 }
 0x4ed   : > { %v1297_v25 = vpop.xlane.xlu1 %1296 }
 0x556   : > { %v1120_v20 = vpop.xlane.xlu0 %1119 }
 0x55a   : > { %v1474_v21 = vpop.xlane.xlu0 %1473 }
 0x55e   : > { %v952_v22 = vpop.xlane.xlu0 %951 }
 0x55f   : > { %2178 = vrcp.f32 %v952_v22 }
 0x560   : > { %2180 = vrcp.f32 %v1120_v20 }
 0x561   : > { %2182 = vrcp.f32 %v1297_v25 }
 0x562   : > { %2184 = vrcp.f32 %v1474_v21 }
 0x569   : > { %v2179_v23 = vpop.eup %2178 }
 0x56a   : > { %v1027_v24 = vmul.f32 %v2179_v23, %v1022_v60  ;;  %v2181_v30 = vpop.eup %2180 }
 0x56b   : > { %v2183_v35 = vpop.eup %2182 }
 0x56c   : > { %1028 = vst.msk [vmem:[#allocation5] sm:$0xff] %vm867_vm2, %v1027_v24  ;;  %v2185_v39 = vpop.eup %2184 }
 0x59b   : > { %v1194_v31 = vpop.f32.mrb[8].mxu1 }
 0x59c   : > { %v1199_v33 = vmul.f32 %v2181_v30, %v1194_v31  ;;  %v1990_v34 = vpop.f32.mrb[9].mxu1 }
 0x59e   : > { %1201 = vrot.lane.b32.xlu1 %v1199_v33, %s2501_s7  ;;  %s3016_s7 = scalar_lea.hbm %s3153_s19, %s1899_s13 }
 0x59f   : > { %v1371_v36 = vpop.f32.mrb[10].mxu1 }
 0x5a0   : > { %v1376_v37 = vmul.f32 %v2183_v35, %v1371_v36  ;;  %v2000_v38 = vpop.f32.mrb[11].mxu1 }
 0x5a2   : > { %1378 = vrot.lane.b32.xlu0 %v1376_v37, %s2502_s15  ;;  %s1678_s15 = scalar_lea.sflag [#allocation8], %s2874_s29 }
 0x5a3   : > { %v1548_v40 = vpop.f32.mrb[12].mxu1 }
 0x5a4   : > { %v1553_v41 = vmul.f32 %v2185_v39, %v1548_v40  ;;  %v2010_v42 = vpop.f32.mrb[13].mxu1 }
 0x5a6   : > { %1555 = vrot.lane.b32.xlu1 %v1553_v41, %s2503_s22  ;;  %s2390_s22 = scalar_lea.vmem %s3018_s28, 128 }
 0x5a7   : > { %p2391_p13 = scmp.ne.s32.totalorder %s3018_s28, %s2390_s22  ;;  %p2398_p9 = scmp.lt.s32.totalorder %s2396_s11, %s2390_s22 }
 0x5a9   : > { %p2392_p1 = pnand %p2391_p13, %p3154_p2  ;;  %p2399_p7 = por %p2398_p9, %p2397_p8 }
 0x5ab   : > { %p2393_p12 = pneg %p2392_p1 }
 0x5ad   : > { %p2400_p11 = pnand %p2399_p7, %p2393_p12 }
 0x610   : > { %v1202_v43 = vpop.permute.xlu1 %1201 }
 0x611   : > { %1205 = vst.msk [vmem:[#allocation5] sm:$0xff] %vm1204_vm3, %v1202_v43 }
 0x614   : > { %v1379_v0 = vpop.permute.xlu0 %1378 }
 0x615   : > { %1382 = vst.msk [vmem:[#allocation5] sm:$0xff] %vm1381_vm4, %v1379_v0 }
 0x618   : > { %v1556_v44 = vpop.permute.xlu1 %1555 }
 0x619   : > { %1559 = vst.msk [vmem:[#allocation5] sm:$0xff] %vm1558_vm5, %v1556_v44 }
 0x620   : > { %v1560_v45 = vld [vmem:[#allocation5] sm:$0xff] }
 0x621   : > { %2020 = vmatmul.mubr.msk.f32.vlgmr.msra.gmra.mrb[8].mxu0 %vm616_vm1, %v1560_v45 }
 0x6f4   : > { %v1641_v47 = vpop.f32.mrb[8].mxu0 }
 0x6f5   : > { %v1642_v48 = vadd.f32 %v1894_v46, %v1641_v47  ;;  %v2021_v49 = vpop.f32.mrb[9].mxu0 }
 0x6f7   : > { %v1645_v50 = vadd.f32 %v1642_v48, %v2915_v18  ;;  %v1896_v18 = vld [vmem:[%s3151_s3] ss:$0 sm:$0xff] }
 0x6f9   : > { %v1646_v51 = vsel %vm616_vm1, %v1645_v50, 0.0 }
 0x6fa   : > { %1647 = vadd.xlane.f32.xlu1 %v1646_v51 }
 0x787   : > { %v1648_v52 = vpop.xlane.xlu1 %1647 }
 0x788   : > { %v1650_v53 = vmul.f32 0.03125, %v1648_v52 }
 0x78a   : > { %v1651_v54 = vsub.f32 %v1645_v50, %v1650_v53 }
 0x78c   : > { %v1652_v55 = vmul.f32 %v1651_v54, %v1651_v54 }
 0x78e   : > { %v1653_v56 = vsel %vm616_vm1, %v1652_v55, 0.0 }
 0x78f   : > { %1654 = vadd.xlane.f32.xlu0 %v1653_v56 }
 0x81c   : > { %v1655_v57 = vpop.xlane.xlu0 %1654 }
 0x81d   : > { %v1656_v58 = vmul.f32 0.03125, %v1655_v57 }
 0x81f   : > { %v1657_v59 = vadd.f32 1e-05, %v1656_v58 }
 0x821   : > { %2186 = vrsqrt.f32 %v1657_v59 }
 0x82b   : > { %v2187_v60 = vpop.eup %2186 }
 0x82c   : > { %v1659_v61 = vmul.f32 %v2187_v60, %v1651_v54 }
 0x82e   : > { %v1667_v63 = vmul.f32 %v1896_v18, %v1659_v61 }
 0x830   : > { %v1675_v2 = vadd.f32 %v1897_v62, %v1667_v63 }
 0x832   : > { %1676 = vst.msk [vmem:[%s599_s20] sm:$0xff] %vm616_vm1, %v1675_v2 }
 0x833   : > { %2403 = shalt.err (!%p2400_p11)
}
 0x834   : > { %s2404_s29 = scalar_lea.hbm %s3016_s7, 128  ;;  %s2408_s23 = scalar_lea.hbm %s3153_s19, 256 }
 0x835   : > { %p2405_p5 = scmp.ne.s32.totalorder %s3016_s7, %s2404_s29  ;;  %p2409_p0 = scmp.lt.u32.totalorder %s3016_s7, %s3153_s19 }
 0x836   : > { %p2410_p4 = scmp.lt.u32.totalorder %s2408_s23, %s2404_s29  ;;  %p2412_p13 = scmp.lt.u32.totalorder %s2404_s29, %s3016_s7 }
 0x837   : > { %p2406_p3 = pnand %p2405_p5, %p3154_p2 }
 0x838   : > { %p2411_p10 = por %p2410_p4, %p2409_p0 }
 0x839   : > { %p2407_p6 = pneg %p2406_p3 }
 0x83a   : > { %p2413_p1 = por %p2412_p13, %p2411_p10 }
 0x83c   : > { %p2414_p12 = pnand %p2413_p1, %p2407_p6 }
 0x83e   : > { %2417 = shalt.err (!%p2414_p12)
}
 0x83f   : > { %2068 = dma.vmem_to_hbm [thread:$0]  (%p3154_p2), %s3018_s28, 128, %s3016_s7, %s1678_s15  }
 0x840 PF: > { %s3155_s25 = sld [smem:[#allocation24_spill]]  ;;  %s3156_s21 = sld [smem:[#allocation31_spill]] }
 0x841   : > { %s3157_s17 = sld [smem:[#allocation27_spill]] }
 0x846   : > { %s1704_s13 = sand.u32 1, %s3155_s25   ;;  %p3158_p8 = scmp.ne.s32.totalorder %s3156_s21, 0 }
 0x847   : > { %p3159_p9 = scmp.ge.s32.totalorder %s3157_s17, 2  ;;  %s1705_s20 = scalar_lea.sflag [#allocation8], %s1704_s13 }
 0x849   : > { %p2094_p7 = pnand %p3159_p9, %p3158_p8 }
 0x84b   : > { %2459 = dma.done.wait (!%p2094_p7), %s1705_s20, 128  }
 0x84c   : > { %2461 = vsyncadd (!%p2094_p7), %s1705_s20, 4294967168  ;;  %s34_s30 = sadd.s32 1, %s3157_s17   ;;  %s3160_s12 = sld [smem:[#allocation30_spill]] }
 0x84d   : > { %p31_p11 = scmp.ge.s32.totalorder %s34_s30, 4   ;;  %s3161_s28 = sld [smem:[#allocation26_spill]] }
 0x84e   : > { %s3162_s29 = sld [smem:[#allocation28_spill]]  ;;  %s3163_s25 = smov %s2468_s26 }
 0x84f   : > { %s3164_s26 = smov %s2472_s27  ;;  %33 = sbr.rel (!%p31_p11) target bundleno = 19 (0x13), region = 161 }
 0x852   : > { %s3165_s27 = smov %s3160_s12 }
 0x856   :  { %1710 = vsyncpa [#allocation7], 1 }
 0x857   :  { %1712 = vsyncpa [#allocation7 + $0x1], 1 }
 0x858   :  { %1713 = vsyncpa [#allocation10], 1 }
 0x859   :  { %1715 = vsyncpa [#allocation10 + $0x1], 1 }
 0x85a   :  { %1716 = vsyncpa [#allocation13], 1 }
 0x85b   :  { %1717 = vsyncpa [#allocation16], 1 }
 0x85c   :  { %1718 = vsyncpa [#allocation8], 1 }
 0x85d   :  { %1720 = vsyncpa [#allocation8 + $0x1], 1 }

</bundles_post_ra>
